<compile_context>
chip_gen: v7x
topology: tpu7x:2x2x1
jax: 0.10.0
libtpu: 0.0.40
codegen_flags: <defaults>
</compile_context>

<pallas_src>
import jax
import jax.numpy as jnp
from jax.experimental import pallas as pl
from jax.experimental.pallas import tpu as pltpu

_LANE = 128        # vreg lane width (all TPU generations)
_BATCH_ALIGN = 16  # bf16 sublane packing for the matmul M dim
_TB_CAP = 1024     # rows per batch tile (double-buffered tiles ~1 MiB total)


def _round_up(n, m):
    return ((n + m - 1) // m) * m


def _choose_batch_tile(B):
    """Pick the batch tile: aligned to 16, capped at _TB_CAP, and for
    non-tiny batches split into >= 2 tiles so v7x's 2nd TensorCore gets work
    (harmless on v5e/v6e) while keeping batch-padding waste small."""
    if B <= 2 * _BATCH_ALIGN:
        return _round_up(B, _BATCH_ALIGN)
    n_tiles = max(2, -(-B // _TB_CAP))
    return _round_up(-(-B // n_tiles), _BATCH_ALIGN)


def linearnet_kernel(x_ref, w1_ref, b1_ref, w2_ref, b2_ref, o_ref):
    # body: h = relu(x @ W1 + b1)  (bf16 MXU operands, f32 accum/epilogue)
    x = x_ref[...].astype(jnp.bfloat16)          # cast in-kernel; x read once
    h = jnp.dot(x, w1_ref[...], preferred_element_type=jnp.float32)
    h = jnp.maximum(h + b1_ref[...], 0.0)        # b1 broadcasts over batch
    # head: y = h @ W2 + b2
    y = jnp.dot(h.astype(jnp.bfloat16), w2_ref[...],
                preferred_element_type=jnp.float32)
    o_ref[...] = (y + b2_ref[...]).astype(o_ref.dtype)


def prepare_linearnet_params(w1, b1, w2, b2):
    """One-time param prep (outside the hot path): transpose PyTorch-layout
    weights to [in, out], zero-pad only the (VMEM-resident) feature dim to a
    multiple of 128, cast matmul operands to bf16. Biases stay f32."""
    feat_dim, in_dim = w1.shape
    out_dim = w2.shape[0]
    feat_pad = _round_up(feat_dim, _LANE)

    w1_t = jnp.zeros((in_dim, feat_pad), jnp.bfloat16)
    w1_t = w1_t.at[:, :feat_dim].set(w1.T.astype(jnp.bfloat16))
    w2_t = jnp.zeros((feat_pad, out_dim), jnp.bfloat16)
    w2_t = w2_t.at[:feat_dim, :].set(w2.T.astype(jnp.bfloat16))
    b1_p = jnp.zeros((1, feat_pad), jnp.float32)
    b1_p = b1_p.at[0, :feat_dim].set(b1.astype(jnp.float32))
    b2_p = b2.astype(jnp.float32).reshape(1, out_dim)

    return {
        "w1": w1_t, "b1": b1_p, "w2": w2_t, "b2": b2_p,
        "in_dim": in_dim, "feat_dim": feat_dim, "out_dim": out_dim,
    }


def linear_net(x, params):
    """x: [B, in_dim] f32. Returns [B, out_dim] f32 (module semantics)."""
    w1, b1, w2, b2 = params["w1"], params["b1"], params["w2"], params["b2"]
    in_dim, out_dim = params["in_dim"], params["out_dim"]
    feat_pad = w1.shape[1]
    B = x.shape[0]

    tb = _choose_batch_tile(B)
    b_pad = _round_up(B, tb)

    # Pad the batch dim only when needed (no-op for tile-aligned batches);
    # the lane dim stays at its natural width -> no extra pad/cast pass on x.
    x_in = x if b_pad == B else jnp.pad(x, ((0, b_pad - B), (0, 0)))

    grid = (b_pad // tb,)
    flops = 2 * b_pad * (in_dim * feat_pad + feat_pad * out_dim)
    bytes_accessed = (b_pad * in_dim * 4            # x (f32)
                      + w1.size * 2 + w2.size * 2   # bf16 weights
                      + b1.size * 4 + b2.size * 4   # f32 biases
                      + b_pad * out_dim * 4)        # output (f32, narrow)

    out = pl.pallas_call(
        linearnet_kernel,
        out_shape=jax.ShapeDtypeStruct((b_pad, out_dim), jnp.float32),
        grid=grid,
        in_specs=[
            pl.BlockSpec((tb, in_dim), lambda i: (i, 0)),        # x: per-tile
            pl.BlockSpec((in_dim, feat_pad), lambda i: (0, 0)),  # W1: resident
            pl.BlockSpec((1, feat_pad), lambda i: (0, 0)),       # b1: resident
            pl.BlockSpec((feat_pad, out_dim), lambda i: (0, 0)), # W2: resident
            pl.BlockSpec((1, out_dim), lambda i: (0, 0)),        # b2: resident
        ],
        out_specs=pl.BlockSpec((tb, out_dim), lambda i: (i, 0)),
        compiler_params=pltpu.CompilerParams(
            dimension_semantics=("parallel",)),
        cost_estimate=pl.CostEstimate(
            flops=flops, transcendentals=0, bytes_accessed=bytes_accessed),
    )(x_in, w1, b1, w2, b2)

    if b_pad != B:
        out = out[:B]
    return out


def _reference(x, w1, b1, w2, b2):
    h = jnp.maximum(x @ w1.T + b1, 0.0)
    return h @ w2.T + b2


if __name__ == "__main__":
    # Small shapes consistent with the module: batch=8, in_dim=32,
    # body.feature_dim=64, output_dim=16.
    B, IN, FEAT, OUT = 8, 32, 64, 16

    key = jax.random.PRNGKey(0)
    kx, kw1, kb1, kw2, kb2 = jax.random.split(key, 5)

    x = jax.random.normal(kx, (B, IN), dtype=jnp.float32)

    # layer_init-style deterministic synthetic weights (no checkpoint load).
    w1 = jax.random.normal(kw1, (FEAT, IN), dtype=jnp.float32) * (1.0 / jnp.sqrt(IN))
    b1 = jax.random.normal(kb1, (FEAT,), dtype=jnp.float32) * 0.1
    w2 = jax.random.normal(kw2, (OUT, FEAT), dtype=jnp.float32) * (1.0 / jnp.sqrt(FEAT))
    b2 = jax.random.normal(kb2, (OUT,), dtype=jnp.float32) * 0.1

    params = prepare_linearnet_params(w1, b1, w2, b2)   # one-time, hoisted
    out = jax.block_until_ready(linear_net(x, params))

    ref = _reference(x, w1, b1, w2, b2)
    assert out.shape == (B, OUT)
    # bf16 MXU operands with f32 accumulation -> widened tolerance vs f32 ref.
    assert jnp.allclose(out, ref, atol=5e-2, rtol=5e-2), "mismatch vs reference"

    print("KERNEL_OK")
</pallas_src>

<mosaic_0001>
module attributes {stable_mosaic.version = 11 : i64} {
  func.func @linearnet_kernel(%arg0: i32, %arg1: memref<16x32xf32, #tpu.memory_space<vmem>>, %arg2: memref<32x128xbf16, #tpu.memory_space<vmem>>, %arg3: memref<1x128xf32, #tpu.memory_space<vmem>>, %arg4: memref<128x16xbf16, #tpu.memory_space<vmem>>, %arg5: memref<1x16xf32, #tpu.memory_space<vmem>>, %arg6: memref<16x16xf32, #tpu.memory_space<vmem>>) attributes {dimension_semantics = [#tpu.dimension_semantics<parallel>], iteration_bounds = array<i64: 1>, scalar_prefetch = 0 : i64, scratch_operands = 0 : i64, tpu.core_type = #tpu.core_type<tc>, window_params = [{transform_indices = @transform_0, window_bounds = array<i64: 16, 32>}, {pipeline_mode = #tpu.pipeline_mode<synchronous>, transform_indices = @transform_1, window_bounds = array<i64: 32, 128>}, {pipeline_mode = #tpu.pipeline_mode<synchronous>, transform_indices = @transform_2, window_bounds = array<i64: 1, 128>}, {pipeline_mode = #tpu.pipeline_mode<synchronous>, transform_indices = @transform_3, window_bounds = array<i64: 128, 16>}, {pipeline_mode = #tpu.pipeline_mode<synchronous>, transform_indices = @transform_4, window_bounds = array<i64: 1, 16>}, {transform_indices = @transform_5, window_bounds = array<i64: 16, 16>}]} {
    %c0 = arith.constant 0 : index
    %c0_0 = arith.constant 0 : index
    %0 = vector.load %arg1[%c0, %c0_0] : memref<16x32xf32, #tpu.memory_space<vmem>>, vector<16x32xf32>
    %1 = arith.truncf %0 : vector<16x32xf32> to vector<16x32xbf16>
    %c0_1 = arith.constant 0 : index
    %c0_2 = arith.constant 0 : index
    %2 = vector.load %arg2[%c0_1, %c0_2] : memref<32x128xbf16, #tpu.memory_space<vmem>>, vector<32x128xbf16>
    %cst = arith.constant dense<0.000000e+00> : vector<16x128xf32>
    %3 = tpu.matmul %1, %2, %cst {dimension_numbers = #tpu.dot_dimension_numbers<[1], [0], [0], [1], [0, 0, 1, 1], [], []>} : vector<16x32xbf16>, vector<32x128xbf16>, vector<16x128xf32> -> vector<16x128xf32>
    %c0_3 = arith.constant 0 : index
    %c0_4 = arith.constant 0 : index
    %4 = vector.load %arg3[%c0_3, %c0_4] : memref<1x128xf32, #tpu.memory_space<vmem>>, vector<1x128xf32>
    %5 = vector.broadcast %4 : vector<1x128xf32> to vector<16x128xf32>
    %6 = arith.addf %3, %5 : vector<16x128xf32>
    %cst_5 = arith.constant 0.000000e+00 : f32
    %7 = vector.broadcast %cst_5 : f32 to vector<16x128xf32>
    %8 = arith.maximumf %6, %7 : vector<16x128xf32>
    %9 = arith.truncf %8 : vector<16x128xf32> to vector<16x128xbf16>
    %c0_6 = arith.constant 0 : index
    %c0_7 = arith.constant 0 : index
    %10 = vector.load %arg4[%c0_6, %c0_7] : memref<128x16xbf16, #tpu.memory_space<vmem>>, vector<128x16xbf16>
    %cst_8 = arith.constant dense<0.000000e+00> : vector<16x16xf32>
    %11 = tpu.matmul %9, %10, %cst_8 {dimension_numbers = #tpu.dot_dimension_numbers<[1], [0], [0], [1], [0, 0, 1, 1], [], []>} : vector<16x128xbf16>, vector<128x16xbf16>, vector<16x16xf32> -> vector<16x16xf32>
    %c0_9 = arith.constant 0 : index
    %c0_10 = arith.constant 0 : index
    %12 = vector.load %arg5[%c0_9, %c0_10] : memref<1x16xf32, #tpu.memory_space<vmem>>, vector<1x16xf32>
    %13 = vector.broadcast %12 : vector<1x16xf32> to vector<16x16xf32>
    %14 = arith.addf %11, %13 : vector<16x16xf32>
    %c0_11 = arith.constant 0 : index
    %c0_12 = arith.constant 0 : index
    %15 = vector.load %arg6[%c0_11, %c0_12] : memref<16x16xf32, #tpu.memory_space<vmem>>, vector<16x16xf32>
    tpu.vector_store %arg6[%c0_11, %c0_12], %14 {strides = array<i32>} : memref<16x16xf32, #tpu.memory_space<vmem>>, vector<16x16xf32>,
    return
  }
  func.func @transform_0(%arg0: i32) -> (i32, i32) {
    %c0_i32 = arith.constant 0 : i32
    %c0_i32_0 = arith.constant 0 : i32
    return %arg0, %c0_i32 : i32, i32
  }
  func.func @transform_1(%arg0: i32) -> (i32, i32) {
    %c0_i32 = arith.constant 0 : i32
    %c0_i32_0 = arith.constant 0 : i32
    %c0_i32_1 = arith.constant 0 : i32
    return %c0_i32, %c0_i32_0 : i32, i32
  }
  func.func @transform_2(%arg0: i32) -> (i32, i32) {
    %c0_i32 = arith.constant 0 : i32
    %c0_i32_0 = arith.constant 0 : i32
    %c0_i32_1 = arith.constant 0 : i32
    return %c0_i32, %c0_i32_0 : i32, i32
  }
  func.func @transform_3(%arg0: i32) -> (i32, i32) {
    %c0_i32 = arith.constant 0 : i32
    %c0_i32_0 = arith.constant 0 : i32
    %c0_i32_1 = arith.constant 0 : i32
    return %c0_i32, %c0_i32_0 : i32, i32
  }
  func.func @transform_4(%arg0: i32) -> (i32, i32) {
    %c0_i32 = arith.constant 0 : i32
    %c0_i32_0 = arith.constant 0 : i32
    %c0_i32_1 = arith.constant 0 : i32
    return %c0_i32, %c0_i32_0 : i32, i32
  }
  func.func @transform_5(%arg0: i32) -> (i32, i32) {
    %c0_i32 = arith.constant 0 : i32
    %c0_i32_0 = arith.constant 0 : i32
    return %arg0, %c0_i32 : i32, i32
  }
}

</mosaic_0001>

<bundles_post_ra>
// kernel: tpu_custom_call.1
= control target key start
LH: loop header
LB: loop body
LE: loop exit
PB: predicated region body
PF: predicated region fallthrough
CT: control target
= control target key end

     0   :  { %v319_v1 = vmov 0.0   ;;  %vm320_vm0 = vmmov 0   ;;  %vm48_vm1 = vcmask 261120   ;;  %s408_s0 = inlined_call_operand.vmem [shape: f32[16,32], index: 0, kind: input, shape index: {}]   ;;  %s409_s1 = inlined_call_operand.vmem [shape: bf16[32,128], index: 1, kind: input, shape index: {}]   ;;  %s410_s2 = inlined_call_operand.vmem [shape: f32[1,128], index: 2, kind: input, shape index: {}]   ;;  %s411_s3 = inlined_call_operand.vmem [shape: bf16[128,16], index: 3, kind: input, shape index: {}]   ;;  %s412_s4 = inlined_call_operand.vmem [shape: f32[1,16], index: 4, kind: input, shape index: {}]   ;;  %s413_s5 = inlined_call_operand.hbm [shape: f32[16,16], index: 5, kind: output, shape index: {}]  }
   0x1   :  { %v285_v0 = vld [vmem:[%s409_s1] sm:$0xff]   ;;  %252 = vmatprep.subr.bf16.mxu0 %v319_v1  ;;  %v286_v2 = vld [vmem:[%s409_s1 + $0x8] sm:$0xff]   ;;  %260 = vmatprep.subr.bf16.mxu1 %v319_v1  ;;  %v289_v8 = vld [vmem:[%s411_s3 + $0x10] sm:$0xff]  }
   0x2   :  { %253 = vmatpush3.bf16.msra.mxu0 %v285_v0  ;;  %256 = vmatprep.mubr.msk.bf16.mxu0 %vm320_vm0, %v319_v1  ;;  %v22_v3 = vld [vmem:[%s408_s0] sm:$0xff]  ;;  %v23_v4 = vld [vmem:[%s408_s0 + $0x8] sm:$0xff] }
   0x3   :  { %254 = vmatprep.subr.bf16.mxu0 %v319_v1  ;;  %v287_v5 = vld [vmem:[%s411_s3] sm:$0xff]   ;;  %276 = vmatprep.mubr.msk.bf16.mxu1 %vm320_vm0, %v319_v1  ;;  %v24_v6 = vpack.c.bf16 %v23_v4, %v22_v3  ;;  %v288_v7 = vld [vmem:[%s411_s3 + $0x8] sm:$0xff]  }
   0x4   :  { %261 = vmatpush3.bf16.msra.mxu1 %v287_v5 }
   0x5   :  { %262 = vmatprep.subr.bf16.mxu1 %v319_v1 }
   0x6   :  { %255 = vmatpush3.bf16.msra.mxu0 %v286_v2 }
   0x8   :  { %263 = vmatpush3.bf16.msra.mxu1 %v288_v7 }
   0x9   :  { %257 = vmatmul.mubr.msk.bf16.vlgmr.msra.gmra.mrb[0].mxu0 %vm48_vm1, %v24_v6  ;;  %264 = vmatprep.subr.bf16.mxu1 %v319_v1 }
   0xa   :  { %10 = vsyncpa [#allocation3], 0  ;;  %v290_v9 = vld [vmem:[%s411_s3 + $0x18] sm:$0xff]   ;;  %v291_v10 = vld [vmem:[%s411_s3 + $0x20] sm:$0xff]   ;;  %vm208_vm2 = vcmask 130048  }
   0xb   :  { %v292_v11 = vld [vmem:[%s411_s3 + $0x28] sm:$0xff]   ;;  %v293_v12 = vld [vmem:[%s411_s3 + $0x30] sm:$0xff]   ;;  %v294_v13 = vld [vmem:[%s411_s3 + $0x38] sm:$0xff]   ;;  %s321_s3 = smov [#allocation2]  }
   0xc   :  { %265 = vmatpush3.bf16.msra.mxu1 %v289_v8  ;;  %v227_v14 = vld [vmem:[%s410_s2] ss:$0 sm:$0xff]  ;;  %s216_s19 = sshll.u32 %s321_s3, 4  ;;  %s217_s19 = int_to_ptr.vmem [resolvable:$true] %s216_s19 }
   0xd   :  { %266 = vmatprep.subr.bf16.mxu1 %v319_v1  ;;  %v231_v24 = vld [vmem:[%s412_s4] ss:$0 sm:$0xff]  ;;  %s295_s2 = scalar_lea.vmem %s217_s19, 256  ;;  %p300_p1 = scmp.lt.s32.totalorder %s217_s19, %s217_s19 }
   0xe   :  { %p296_p0 = scmp.ne.s32.totalorder %s217_s19, %s295_s2  ;;  %p301_p2 = scmp.lt.s32.totalorder %s295_s2, %s295_s2 }
  0x10   :  { %267 = vmatpush3.bf16.msra.mxu1 %v290_v9  ;;  %p302_p3 = por %p301_p2, %p300_p1 }
  0x11   :  { %268 = vmatprep.subr.bf16.mxu1 %v319_v1 }
  0x12   :  { %p303_p4 = pnand %p302_p3, %p296_p0 }
  0x14   :  { %269 = vmatpush3.bf16.msra.mxu1 %v291_v10 }
  0x15   :  { %270 = vmatprep.subr.bf16.mxu1 %v319_v1 }
  0x18   :  { %271 = vmatpush3.bf16.msra.mxu1 %v292_v11 }
  0x19   :  { %272 = vmatprep.subr.bf16.mxu1 %v319_v1 }
  0x1c   :  { %273 = vmatpush3.bf16.msra.mxu1 %v293_v12 }
  0x1d   :  { %274 = vmatprep.subr.bf16.mxu1 %v319_v1 }
  0x20   :  { %275 = vmatpush3.bf16.msra.mxu1 %v294_v13 }
  0xdc   :  { %v86_v15 = vpop.f32.mrb[0].mxu0 }
  0xdd   :  { %v87_v16 = vadd.f32 %v227_v14, %v86_v15  ;;  %v258_v17 = vpop.f32.mrb[1].mxu0 }
  0xde   :  { %v89_v18 = vpop.f32.mrb[2].mxu0 }
  0xdf   :  { %v90_v19 = vadd.f32 %v227_v14, %v89_v18  ;;  %v259_v20 = vpop.f32.mrb[3].mxu0  ;;  %v93_v21 = vmax.f32 %v87_v16, 0.0 }
  0xe1   :  { %v94_v22 = vmax.f32 %v90_v19, 0.0 }
  0xe3   :  { %v95_v23 = vpack.c.bf16 %v94_v22, %v93_v21 }
  0xe5   :  { %277 = vmatmul.mubr.bf16.vlgmr.msra.gmra.mrb[0].mxu1 %v95_v23 }
 0x1b8   :  { %v201_v25 = vpop.f32.mrb[0].mxu1 }
 0x1b9   :  { %v202_v26 = vadd.f32 %v231_v24, %v201_v25  ;;  %v278_v27 = vpop.f32.mrb[1].mxu1 }
 0x1ba   :  { %v204_v28 = vpop.f32.mrb[2].mxu1 }
 0x1bb   :  { %209 = vst.msk [vmem:[#allocation2] sm:$0xff] %vm208_vm2, %v202_v26  ;;  %v205_v29 = vadd.f32 %v231_v24, %v204_v28  ;;  %v279_v30 = vpop.f32.mrb[3].mxu1 }
 0x1bd   :  { %210 = vst.msk [vmem:[#allocation2 + $0x8] sm:$0xff] %vm208_vm2, %v205_v29 }
 0x1be   :  { %306 = shalt.err (!%p303_p4)
}
 0x1bf   :  { %s307_s21 = scalar_lea.hbm %s413_s5, 256 }
 0x1c0   :  { %p308_p5 = scmp.ne.s32.totalorder %s413_s5, %s307_s21  ;;  %p311_p6 = scmp.lt.u32.totalorder %s307_s21, %s413_s5 }
 0x1c2   :  { %p313_p7 = pnand %p311_p6, %p308_p5 }
 0x1c4   :  { %316 = shalt.err (!%p313_p7)
}
 0x1c5   :  { %s322_s26 = smov 128   ;;  %s323_s27 = smov 8  }
 0x1c6   :  { %222 = dma.vmem_to_hbm [thread:$0]  %s217_s19, 256, %s413_s5, [#allocation3], %s322_s26, %s322_s26, %s323_s27  }
 0x1c7   :  { %317 = dma.done.wait [#allocation3], 256  }
 0x1c8   :  { %318 = vsyncadd [#allocation3], 4294967040 }
 0x1c9   :  { %226 = vsyncpa [#allocation3], 1 }

</bundles_post_ra>
